<compile_context>
chip_gen: v5e
topology: v5e:2x2
jax: 0.10.0
libtpu: 0.0.40
codegen_flags: <defaults>
</compile_context>

<pallas_src>
import functools

import jax
import jax.numpy as jnp
from jax.experimental import pallas as pl
from jax.experimental.pallas import tpu as pltpu


_HIGHEST = jax.lax.Precision.HIGHEST


def _global_context_kernel(x_ref, wk_ref, bk_ref, w1t_ref, b1_ref, w2t_ref,
                           b2_ref, o_ref, m_sc, l_sc, acc_sc, *,
                           n_total, needs_mask):
    n_idx = pl.program_id(1)
    n_last = pl.num_programs(1) - 1

    @pl.when(n_idx == 0)
    def _init():
        m_sc[...] = jnp.full_like(m_sc, -jnp.inf)
        l_sc[...] = jnp.zeros_like(l_sc)
        acc_sc[...] = jnp.zeros_like(acc_sc)

    # x streams from HBM in the caller's dtype (bf16 halves HBM traffic); all
    # arithmetic runs in f32 (v5e has no bf16 VALU; scratch stays f32).
    x = x_ref[0].astype(jnp.float32)                 # (C, NT)
    nt = x.shape[-1]

    if needs_mask:
        lane = jax.lax.broadcasted_iota(jnp.int32, (1, nt), 1)
        valid = (n_idx * nt + lane) < n_total        # (1, NT)
        # Mask x once up front: keeps OOB pad garbage (possibly NaN) out of the
        # MXU accumulate below; logits additionally get the -inf mask.
        x = jnp.where(valid, x, 0.0)

    # to_k 1x1 conv == attention logits: VPU broadcast-multiply + sublane
    # reduce (keeps this tiny GEMV off the MXU slot used by the pooling dot).
    logits = jnp.sum(wk_ref[...] * x, axis=0, keepdims=True) + bk_ref[0]   # (1, NT)
    if needs_mask:
        logits = jnp.where(valid, logits, -jnp.inf)

    # Online softmax over the flattened spatial (lane) axis.
    m_prev = m_sc[...]                                                     # (1, 1)
    m_new = jnp.maximum(m_prev, jnp.max(logits, axis=-1, keepdims=True))   # (1, 1)
    alpha = jnp.exp(m_prev - m_new)                                        # (1, 1)
    p = jnp.exp(logits - m_new)                                            # (1, NT)
    l_sc[...] = alpha * l_sc[...] + jnp.sum(p, axis=-1, keepdims=True)

    # Weighted pooling as a (1, NT) x (C, NT)^T contraction on the MXU
    # (otherwise idle on this kernel); frees the per-step (C, NT) VPU multiply
    # + XLU lane reduce and keeps the accumulator a lane-dense (1, C) row.
    part = jax.lax.dot_general(
        p, x, dimension_numbers=(((1,), (1,)), ((), ())),
        preferred_element_type=jnp.float32, precision=_HIGHEST)            # (1, C)
    acc_sc[...] = alpha * acc_sc[...] + part
    m_sc[...] = m_new

    @pl.when(n_idx == n_last)
    def _finalize():
        # Cold path, once per batch row: tiny MLP head on the pooled channel
        # row.  pl.reciprocal stays exact (runs once; preserves ref match).
        pooled = acc_sc[...] * pl.reciprocal(l_sc[...])                    # (1, C)
        y1 = jnp.dot(pooled, w1t_ref[...],
                     preferred_element_type=jnp.float32,
                     precision=_HIGHEST) + b1_ref[...]                     # (1, Hd)
        y1 = y1 * jax.nn.sigmoid(y1)                                       # SiLU
        y2 = jnp.dot(y1, w2t_ref[...],
                     preferred_element_type=jnp.float32,
                     precision=_HIGHEST) + b2_ref[...]                     # (1, D)
        o_ref[0] = jax.nn.sigmoid(y2)                                      # lane-dense


def _vmem_capacity_bytes(default=64 << 20):
    """Generation-aware physical VMEM (128 MiB v5e/v6e, 64 MiB v7x)."""
    try:
        cap = getattr(pltpu.get_tpu_info(), "vmem_capacity_bytes", None)
        if cap:
            return int(cap)
    except Exception:
        pass
    return default   # conservative: v7x physical VMEM


def global_context(x, wk, bk, w1, b1, w2, b2, *, n_tile=1024):
    """x: (B, C_in, H, W) f32 or bf16; wk: (1, C_in); bk: (1,); w1: (Hd, C_in);
    b1: (Hd,); w2: (D, Hd); b2: (D,).  Returns (B, D, 1, 1) f32."""
    B, C, H, W = x.shape
    N = H * W
    Hd = w1.shape[0]
    D = w2.shape[0]
    f32 = jnp.float32

    # Glue reshapes / transposes / casts (layout plumbing) stay outside the
    # kernel; activations keep the caller's dtype, weights are tiny and f32.
    x_flat = x.reshape(B, C, N)
    wk_col = wk.astype(f32).reshape(C, 1)     # to_k weight as a (C, 1) column
    bk_s = bk.astype(f32).reshape(1)          # to_k bias -> scalar in SMEM
    w1t = w1.astype(f32).T                    # (C, Hd)
    b1_row = b1.astype(f32).reshape(1, Hd)
    w2t = w2.astype(f32).T                    # (Hd, D)
    b2_row = b2.astype(f32).reshape(1, D)

    itemsize = jnp.dtype(x.dtype).itemsize
    phys_vmem = _vmem_capacity_bytes()
    budget = int(phys_vmem * 3 // 4)          # headroom for weights/out/compiler scratch

    # Spatial tile: full N if it fits in one tile, else a multiple of 128 whose
    # double-buffered x block stays inside this generation's VMEM budget.
    if N <= n_tile and 2 * C * N * itemsize <= budget:
        nt = N
    else:
        assert n_tile >= 128, "n_tile must be >= 128"
        nt = max(128, (min(n_tile, N) // 128) * 128)
        while 2 * C * nt * itemsize > budget and nt > 128:
            nt = max(128, ((nt // 2) // 128) * 128)
    n_steps = pl.cdiv(N, nt)
    needs_mask = (N % nt) != 0

    vmem_limit = int(min(phys_vmem,
                         max(32 << 20, 2 * C * nt * itemsize + (8 << 20))))

    kernel = functools.partial(_global_context_kernel,
                               n_total=N, needs_mask=needs_mask)

    out = pl.pallas_call(
        kernel,
        out_shape=jax.ShapeDtypeStruct((B, 1, D), jnp.float32),
        grid_spec=pltpu.PrefetchScalarGridSpec(
            num_scalar_prefetch=0,
            grid=(B, n_steps),
            in_specs=[
                pl.BlockSpec((1, C, nt), lambda b, n: (b, 0, n)),      # x tile
                pl.BlockSpec((C, 1), lambda b, n: (0, 0)),             # to_k weight
                pl.BlockSpec(memory_space=pltpu.MemorySpace.SMEM),     # to_k bias (scalar)
                pl.BlockSpec((C, Hd), lambda b, n: (0, 0)),            # net[0] weight^T
                pl.BlockSpec((1, Hd), lambda b, n: (0, 0)),            # net[0] bias row
                pl.BlockSpec((Hd, D), lambda b, n: (0, 0)),            # net[2] weight^T
                pl.BlockSpec((1, D), lambda b, n: (0, 0)),             # net[2] bias row
            ],
            out_specs=pl.BlockSpec((1, 1, D), lambda b, n: (b, 0, 0)),  # lane-dense out
            scratch_shapes=[
                pltpu.VMEM((1, 1), jnp.float32),   # running max m
                pltpu.VMEM((1, 1), jnp.float32),   # running denominator l
                pltpu.VMEM((1, C), jnp.float32),   # running weighted pool (row)
            ],
        ),
        compiler_params=pltpu.CompilerParams(
            dimension_semantics=("parallel", "arbitrary"),
            vmem_limit_bytes=vmem_limit,
        ),
    )(x_flat, wk_col, bk_s, w1t, b1_row, w2t, b2_row)
    return out.reshape(B, D, 1, 1)


def global_context_ref(x, wk, bk, w1, b1, w2, b2):
    """Pure-JAX reference mirroring the PyTorch forward (f32, highest precision)."""
    B, C, H, W = x.shape
    xf = x.astype(jnp.float32).reshape(B, C, H * W)
    logits = jnp.einsum("c,bcn->bn", wk[0], xf, precision="highest") + bk[0]
    p = jax.nn.softmax(logits, axis=-1)
    pooled = jnp.einsum("bn,bcn->bc", p, xf, precision="highest")
    y1 = jax.nn.silu(jnp.dot(pooled, w1.T, precision="highest") + b1)
    y2 = jnp.dot(y1, w2.T, precision="highest") + b2
    return jax.nn.sigmoid(y2).reshape(B, -1, 1, 1)


if __name__ == "__main__":
    # Small shapes consistent with the module: B=2, dim_in=4, H=W=16, dim_out=8.
    B, C_in, H, W = 2, 4, 16, 16
    dim_out = 8
    hidden = max(3, dim_out // 2)   # = 4, as in the PyTorch module

    key = jax.random.PRNGKey(0)
    kx, k1, k2, k3, k4, k5, k6, kx2 = jax.random.split(key, 8)

    x = jax.random.normal(kx, (B, C_in, H, W), dtype=jnp.float32)
    # Conv2d(C_in, 1, 1):       weight (1, C_in, 1, 1) -> (1, C_in), bias (1,)
    wk = 0.3 * jax.random.normal(k1, (1, C_in), dtype=jnp.float32)
    bk = 0.1 * jax.random.normal(k2, (1,), dtype=jnp.float32)
    # Conv2d(C_in, hidden, 1):  weight (hidden, C_in), bias (hidden,)
    w1 = 0.3 * jax.random.normal(k3, (hidden, C_in), dtype=jnp.float32)
    b1 = 0.1 * jax.random.normal(k4, (hidden,), dtype=jnp.float32)
    # Conv2d(hidden, dim_out, 1): weight (dim_out, hidden), bias (dim_out,)
    w2 = 0.3 * jax.random.normal(k5, (dim_out, hidden), dtype=jnp.float32)
    b2 = 0.1 * jax.random.normal(k6, (dim_out,), dtype=jnp.float32)

    ref = global_context_ref(x, wk, bk, w1, b1, w2, b2)

    # Case 1: f32, forced n_tile=128 -> two spatial tiles; exercises the
    # online-softmax accumulation across grid steps.  Tolerance budgets the
    # MXU multi-pass f32 matmul (typically ~1e-6 at HIGHEST precision).
    out = jax.block_until_ready(
        global_context(x, wk, bk, w1, b1, w2, b2, n_tile=128))
    assert out.shape == (B, dim_out, 1, 1), out.shape
    assert jnp.allclose(out, ref, atol=5e-4, rtol=5e-4), (
        float(jnp.max(jnp.abs(out - ref))))

    # Case 2: ragged spatial extent (13x13 -> N = 169); exercises the tail mask
    # in front of the MXU pooling dot.
    x2 = jax.random.normal(kx2, (B, C_in, 13, 13), dtype=jnp.float32)
    out2 = jax.block_until_ready(
        global_context(x2, wk, bk, w1, b1, w2, b2, n_tile=128))
    ref2 = global_context_ref(x2, wk, bk, w1, b1, w2, b2)
    assert jnp.allclose(out2, ref2, atol=5e-4, rtol=5e-4), (
        float(jnp.max(jnp.abs(out2 - ref2))))

    # Case 3: bf16 activations (half the HBM bytes), default tile; compute is
    # still f32 in-kernel so only the input quantization widens the tolerance.
    x_bf16 = x.astype(jnp.bfloat16)
    out3 = jax.block_until_ready(
        global_context(x_bf16, wk, bk, w1, b1, w2, b2))
    assert jnp.allclose(out3, ref, atol=2e-2, rtol=2e-2), (
        float(jnp.max(jnp.abs(out3 - ref))))

    print("KERNEL_OK")
</pallas_src>

<mosaic_0001>
module attributes {stable_mosaic.version = 11 : i64} {
  func.func @_global_context_kernel(%arg0: i32, %arg1: i32, %arg2: memref<1x4x128xf32, #tpu.memory_space<vmem>>, %arg3: memref<4x1xf32, #tpu.memory_space<vmem>>, %arg4: memref<1xf32, #tpu.memory_space<smem>>, %arg5: memref<4x4xf32, #tpu.memory_space<vmem>>, %arg6: memref<1x4xf32, #tpu.memory_space<vmem>>, %arg7: memref<4x8xf32, #tpu.memory_space<vmem>>, %arg8: memref<1x8xf32, #tpu.memory_space<vmem>>, %arg9: memref<1x1x8xf32, #tpu.memory_space<vmem>>, %arg10: memref<1x1xf32, #tpu.memory_space<vmem>>, %arg11: memref<1x1xf32, #tpu.memory_space<vmem>>, %arg12: memref<1x4xf32, #tpu.memory_space<vmem>>) attributes {dimension_semantics = [#tpu.dimension_semantics<parallel>, #tpu.dimension_semantics<arbitrary>], iteration_bounds = array<i64: 2, 2>, scalar_prefetch = 0 : i64, scratch_operands = 3 : i64, tpu.core_type = #tpu.core_type<tc>, window_params = [{transform_indices = @transform_0, window_bounds = array<i64: 1, 4, 128>}, {pipeline_mode = #tpu.pipeline_mode<synchronous>, transform_indices = @transform_1, window_bounds = array<i64: 4, 1>}, {transform_indices = @transform_2, window_bounds = array<i64: 1>}, {pipeline_mode = #tpu.pipeline_mode<synchronous>, transform_indices = @transform_3, window_bounds = array<i64: 4, 4>}, {pipeline_mode = #tpu.pipeline_mode<synchronous>, transform_indices = @transform_4, window_bounds = array<i64: 1, 4>}, {pipeline_mode = #tpu.pipeline_mode<synchronous>, transform_indices = @transform_5, window_bounds = array<i64: 4, 8>}, {pipeline_mode = #tpu.pipeline_mode<synchronous>, transform_indices = @transform_6, window_bounds = array<i64: 1, 8>}, {transform_indices = @transform_7, window_bounds = array<i64: 1, 1, 8>}]} {
    %c0_i32 = arith.constant 0 : i32
    %0 = arith.cmpi eq, %arg1, %c0_i32 : i32
    %1 = arith.extui %0 : i1 to i32
    %c0_i32_0 = arith.constant 0 : i32
    %2 = arith.cmpi ne, %1, %c0_i32_0 : i32
    scf.if %2 {
      %cst_22 = arith.constant 0xFF800000 : f32
      %38 = vector.broadcast %cst_22 : f32 to vector<1x1xf32>
      %c0_23 = arith.constant 0 : index
      %c0_24 = arith.constant 0 : index
      %39 = vector.load %arg10[%c0_23, %c0_24] : memref<1x1xf32, #tpu.memory_space<vmem>>, vector<1x1xf32>
      tpu.vector_store %arg10[%c0_23, %c0_24], %38 {strides = array<i32>} : memref<1x1xf32, #tpu.memory_space<vmem>>, vector<1x1xf32>,
      %cst_25 = arith.constant 0.000000e+00 : f32
      %40 = vector.broadcast %cst_25 : f32 to vector<1x1xf32>
      %c0_26 = arith.constant 0 : index
      %c0_27 = arith.constant 0 : index
      %41 = vector.load %arg11[%c0_26, %c0_27] : memref<1x1xf32, #tpu.memory_space<vmem>>, vector<1x1xf32>
      tpu.vector_store %arg11[%c0_26, %c0_27], %40 {strides = array<i32>} : memref<1x1xf32, #tpu.memory_space<vmem>>, vector<1x1xf32>,
      %cst_28 = arith.constant 0.000000e+00 : f32
      %42 = vector.broadcast %cst_28 : f32 to vector<1x4xf32>
      %c0_29 = arith.constant 0 : index
      %c0_30 = arith.constant 0 : index
      %43 = vector.load %arg12[%c0_29, %c0_30] : memref<1x4xf32, #tpu.memory_space<vmem>>, vector<1x4xf32>
      tpu.vector_store %arg12[%c0_29, %c0_30], %42 {strides = array<i32>} : memref<1x4xf32, #tpu.memory_space<vmem>>, vector<1x4xf32>,
    } else {
    }
    %c0 = arith.constant 0 : index
    %c0_1 = arith.constant 0 : index
    %c0_2 = arith.constant 0 : index
    %3 = vector.load %arg2[%c0, %c0_1, %c0_2] : memref<1x4x128xf32, #tpu.memory_space<vmem>>, vector<1x4x128xf32>
    %4 = vector.shape_cast %3 : vector<1x4x128xf32> to vector<4x128xf32>
    %c0_3 = arith.constant 0 : index
    %c0_4 = arith.constant 0 : index
    %5 = vector.load %arg3[%c0_3, %c0_4] : memref<4x1xf32, #tpu.memory_space<vmem>>, vector<4x1xf32>
    %6 = vector.broadcast %5 : vector<4x1xf32> to vector<4x128xf32>
    %7 = arith.mulf %6, %4 : vector<4x128xf32>
    %cst = arith.constant dense<0.000000e+00> : vector<128xf32>
    %8 = vector.multi_reduction <add>, %7, %cst [0] : vector<4x128xf32> to vector<128xf32>
    %9 = vector.shape_cast %8 : vector<128xf32> to vector<1x128xf32>
    %c0_5 = arith.constant 0 : index
    %10 = memref.load %arg4[%c0_5] : memref<1xf32, #tpu.memory_space<smem>>
    %11 = vector.broadcast %10 : f32 to vector<1x128xf32>
    %12 = arith.addf %9, %11 : vector<1x128xf32>
    %c0_6 = arith.constant 0 : index
    %c0_7 = arith.constant 0 : index
    %13 = vector.load %arg10[%c0_6, %c0_7] : memref<1x1xf32, #tpu.memory_space<vmem>>, vector<1x1xf32>
    %cst_8 = arith.constant dense<0xFF800000> : vector<1xf32>
    %14 = vector.multi_reduction <maximumf>, %12, %cst_8 [1] : vector<1x128xf32> to vector<1xf32>
    %15 = vector.shape_cast %14 : vector<1xf32> to vector<1x1xf32>
    %16 = arith.maximumf %13, %15 : vector<1x1xf32>
    %17 = arith.subf %13, %16 : vector<1x1xf32>
    %18 = math.exp %17 : vector<1x1xf32>
    %19 = vector.broadcast %16 : vector<1x1xf32> to vector<1x128xf32>
    %20 = arith.subf %12, %19 : vector<1x128xf32>
    %21 = math.exp %20 : vector<1x128xf32>
    %c0_9 = arith.constant 0 : index
    %c0_10 = arith.constant 0 : index
    %22 = vector.load %arg11[%c0_9, %c0_10] : memref<1x1xf32, #tpu.memory_space<vmem>>, vector<1x1xf32>
    %23 = arith.mulf %18, %22 : vector<1x1xf32>
    %cst_11 = arith.constant dense<0.000000e+00> : vector<1xf32>
    %24 = vector.multi_reduction <add>, %21, %cst_11 [1] : vector<1x128xf32> to vector<1xf32>
    %25 = vector.shape_cast %24 : vector<1xf32> to vector<1x1xf32>
    %26 = arith.addf %23, %25 : vector<1x1xf32>
    %c0_12 = arith.constant 0 : index
    %c0_13 = arith.constant 0 : index
    %27 = vector.load %arg11[%c0_12, %c0_13] : memref<1x1xf32, #tpu.memory_space<vmem>>, vector<1x1xf32>
    tpu.vector_store %arg11[%c0_12, %c0_13], %26 {strides = array<i32>} : memref<1x1xf32, #tpu.memory_space<vmem>>, vector<1x1xf32>,
    %cst_14 = arith.constant dense<0.000000e+00> : vector<1x4xf32>
    %28 = tpu.matmul %21, %4, %cst_14 {dimension_numbers = #tpu.dot_dimension_numbers<[1], [1], [0], [0], [0, 0, 1, 0], [], []>, precision = #tpu.contract_precision<fp32>} : vector<1x128xf32>, vector<4x128xf32>, vector<1x4xf32> -> vector<1x4xf32>
    %c0_15 = arith.constant 0 : index
    %c0_16 = arith.constant 0 : index
    %29 = vector.load %arg12[%c0_15, %c0_16] : memref<1x4xf32, #tpu.memory_space<vmem>>, vector<1x4xf32>
    %30 = vector.broadcast %18 : vector<1x1xf32> to vector<1x4xf32>
    %31 = arith.mulf %30, %29 : vector<1x4xf32>
    %32 = arith.addf %31, %28 : vector<1x4xf32>
    %c0_17 = arith.constant 0 : index
    %c0_18 = arith.constant 0 : index
    %33 = vector.load %arg12[%c0_17, %c0_18] : memref<1x4xf32, #tpu.memory_space<vmem>>, vector<1x4xf32>
    tpu.vector_store %arg12[%c0_17, %c0_18], %32 {strides = array<i32>} : memref<1x4xf32, #tpu.memory_space<vmem>>, vector<1x4xf32>,
    %c0_19 = arith.constant 0 : index
    %c0_20 = arith.constant 0 : index
    %34 = vector.load %arg10[%c0_19, %c0_20] : memref<1x1xf32, #tpu.memory_space<vmem>>, vector<1x1xf32>
    tpu.vector_store %arg10[%c0_19, %c0_20], %16 {strides = array<i32>} : memref<1x1xf32, #tpu.memory_space<vmem>>, vector<1x1xf32>,
    %c1_i32 = arith.constant 1 : i32
    %35 = arith.cmpi eq, %arg1, %c1_i32 : i32
    %36 = arith.extui %35 : i1 to i32
    %c0_i32_21 = arith.constant 0 : i32
    %37 = arith.cmpi ne, %36, %c0_i32_21 : i32
    scf.if %37 {
      %c0_22 = arith.constant 0 : index
      %c0_23 = arith.constant 0 : index
      %38 = vector.load %arg12[%c0_22, %c0_23] : memref<1x4xf32, #tpu.memory_space<vmem>>, vector<1x4xf32>
      %c0_24 = arith.constant 0 : index
      %c0_25 = arith.constant 0 : index
      %39 = vector.load %arg11[%c0_24, %c0_25] : memref<1x1xf32, #tpu.memory_space<vmem>>, vector<1x1xf32>
      %40 = tpu.reciprocal %39 : vector<1x1xf32> -> vector<1x1xf32>
      %41 = vector.broadcast %40 : vector<1x1xf32> to vector<1x4xf32>
      %42 = arith.mulf %38, %41 : vector<1x4xf32>
      %c0_26 = arith.constant 0 : index
      %c0_27 = arith.constant 0 : index
      %43 = vector.load %arg5[%c0_26, %c0_27] : memref<4x4xf32, #tpu.memory_space<vmem>>, vector<4x4xf32>
      %cst_28 = arith.constant dense<0.000000e+00> : vector<1x4xf32>
      %44 = tpu.matmul %42, %43, %cst_28 {dimension_numbers = #tpu.dot_dimension_numbers<[1], [0], [0], [1], [0, 0, 1, 1], [], []>, precision = #tpu.contract_precision<fp32>} : vector<1x4xf32>, vector<4x4xf32>, vector<1x4xf32> -> vector<1x4xf32>
      %c0_29 = arith.constant 0 : index
      %c0_30 = arith.constant 0 : index
      %45 = vector.load %arg6[%c0_29, %c0_30] : memref<1x4xf32, #tpu.memory_space<vmem>>, vector<1x4xf32>
      %46 = arith.addf %44, %45 : vector<1x4xf32>
      %47 = arith.negf %46 : vector<1x4xf32>
      %48 = math.exp %47 : vector<1x4xf32>
      %cst_31 = arith.constant 1.000000e+00 : f32
      %49 = vector.broadcast %cst_31 : f32 to vector<1x4xf32>
      %50 = arith.addf %49, %48 : vector<1x4xf32>
      %51 = arith.divf %49, %50 : vector<1x4xf32>
      %52 = arith.mulf %46, %51 : vector<1x4xf32>
      %c0_32 = arith.constant 0 : index
      %c0_33 = arith.constant 0 : index
      %53 = vector.load %arg7[%c0_32, %c0_33] : memref<4x8xf32, #tpu.memory_space<vmem>>, vector<4x8xf32>
      %cst_34 = arith.constant dense<0.000000e+00> : vector<1x8xf32>
      %54 = tpu.matmul %52, %53, %cst_34 {dimension_numbers = #tpu.dot_dimension_numbers<[1], [0], [0], [1], [0, 0, 1, 1], [], []>, precision = #tpu.contract_precision<fp32>} : vector<1x4xf32>, vector<4x8xf32>, vector<1x8xf32> -> vector<1x8xf32>
      %c0_35 = arith.constant 0 : index
      %c0_36 = arith.constant 0 : index
      %55 = vector.load %arg8[%c0_35, %c0_36] : memref<1x8xf32, #tpu.memory_space<vmem>>, vector<1x8xf32>
      %56 = arith.addf %54, %55 : vector<1x8xf32>
      %57 = arith.negf %56 : vector<1x8xf32>
      %58 = math.exp %57 : vector<1x8xf32>
      %cst_37 = arith.constant 1.000000e+00 : f32
      %59 = vector.broadcast %cst_37 : f32 to vector<1x8xf32>
      %60 = arith.addf %59, %58 : vector<1x8xf32>
      %61 = arith.divf %59, %60 : vector<1x8xf32>
      %c0_38 = arith.constant 0 : index
      %c0_39 = arith.constant 0 : index
      %c0_40 = arith.constant 0 : index
      %62 = vector.load %arg9[%c0_38, %c0_39, %c0_40] : memref<1x1x8xf32, #tpu.memory_space<vmem>>, vector<1x1x8xf32>
      %63 = vector.shape_cast %62 : vector<1x1x8xf32> to vector<1x8xf32>
      %64 = vector.shape_cast %61 : vector<1x8xf32> to vector<1x1x8xf32>
      tpu.vector_store %arg9[%c0_38, %c0_39, %c0_40], %64 {strides = array<i32>} : memref<1x1x8xf32, #tpu.memory_space<vmem>>, vector<1x1x8xf32>,
    } else {
    }
    return
  }
  func.func @transform_0(%arg0: i32, %arg1: i32) -> (i32, i32, i32) {
    %c0_i32 = arith.constant 0 : i32
    %c0_i32_0 = arith.constant 0 : i32
    return %arg0, %c0_i32, %arg1 : i32, i32, i32
  }
  func.func @transform_1(%arg0: i32, %arg1: i32) -> (i32, i32) {
    %c0_i32 = arith.constant 0 : i32
    %c0_i32_0 = arith.constant 0 : i32
    %c0_i32_1 = arith.constant 0 : i32
    return %c0_i32, %c0_i32_0 : i32, i32
  }
  func.func @transform_2(%arg0: i32, %arg1: i32) -> i32 {
    %c0_i32 = arith.constant 0 : i32
    %c0_i32_0 = arith.constant 0 : i32
    return %c0_i32 : i32
  }
  func.func @transform_3(%arg0: i32, %arg1: i32) -> (i32, i32) {
    %c0_i32 = arith.constant 0 : i32
    %c0_i32_0 = arith.constant 0 : i32
    %c0_i32_1 = arith.constant 0 : i32
    return %c0_i32, %c0_i32_0 : i32, i32
  }
  func.func @transform_4(%arg0: i32, %arg1: i32) -> (i32, i32) {
    %c0_i32 = arith.constant 0 : i32
    %c0_i32_0 = arith.constant 0 : i32
    %c0_i32_1 = arith.constant 0 : i32
    return %c0_i32, %c0_i32_0 : i32, i32
  }
  func.func @transform_5(%arg0: i32, %arg1: i32) -> (i32, i32) {
    %c0_i32 = arith.constant 0 : i32
    %c0_i32_0 = arith.constant 0 : i32
    %c0_i32_1 = arith.constant 0 : i32
    return %c0_i32, %c0_i32_0 : i32, i32
  }
  func.func @transform_6(%arg0: i32, %arg1: i32) -> (i32, i32) {
    %c0_i32 = arith.constant 0 : i32
    %c0_i32_0 = arith.constant 0 : i32
    %c0_i32_1 = arith.constant 0 : i32
    return %c0_i32, %c0_i32_0 : i32, i32
  }
  func.func @transform_7(%arg0: i32, %arg1: i32) -> (i32, i32, i32) {
    %c0_i32 = arith.constant 0 : i32
    %c0_i32_0 = arith.constant 0 : i32
    %c0_i32_1 = arith.constant 0 : i32
    return %arg0, %c0_i32, %c0_i32_0 : i32, i32, i32
  }
}

</mosaic_0001>

<bundles_post_ra>
// kernel: tpu_custom_call.1
= control target key start
LH: loop header
LB: loop body
LE: loop exit
PB: predicated region body
PF: predicated region fallthrough
CT: control target
= control target key end

     0   :  { %s1527_s0 = inlined_call_operand.hbm [shape: f32[2,4,256], index: 0, kind: input, shape index: {}]   ;;  %s1528_s1 = inlined_call_operand.vmem [shape: f32[4,1], index: 1, kind: input, shape index: {}]   ;;  %s1529_s2 = inlined_call_operand.<no memory space> [shape: f32[1], index: 2, kind: input, shape index: {}]   ;;  %s1530_s3 = inlined_call_operand.vmem [shape: f32[4,4], index: 3, kind: input, shape index: {}]   ;;  %s1531_s4 = inlined_call_operand.vmem [shape: f32[1,4], index: 4, kind: input, shape index: {}]   ;;  %s1532_s5 = inlined_call_operand.vmem [shape: f32[4,8], index: 5, kind: input, shape index: {}]   ;;  %s1533_s6 = inlined_call_operand.vmem [shape: f32[1,8], index: 6, kind: input, shape index: {}]   ;;  %s1534_s7 = inlined_call_operand.hbm [shape: f32[2,1,8], index: 7, kind: output, shape index: {}]  }
   0x1   :  { %1540 = sst [smem:[#allocation17_spill]] %s1534_s7 }
   0x2   :  { %12 = sst [smem:[#allocation5]] %s1529_s2 }
   0x3   :  { %13 = vsyncpa [#allocation7], 0 }
   0x4   :  { %15 = vsyncpa [#allocation7 + $0x1], 0 }
   0x5   :  { %16 = vsyncpa [#allocation8], 0 }
   0x6   :  { %18 = vsyncpa [#allocation8 + $0x1], 0  ;;  %s1329_s26 = smov 0   ;;  %s1331_s27 = smov 0  }
   0x7   :  { %s1333_s28 = smov 0   ;;  %s1335_s29 = smov 0  }
   0x8   :  { %s1337_s30 = smov 0   ;;  %s1339_s8 = smov 0  }
   0x9   :  { %s1341_s9 = smov 0   ;;  %s1343_s10 = smov 0  }
   0xa   :  { %s1345_s2 = smov 0   ;;  %s1347_s11 = smov 0  }
   0xb   :  { %s1349_s12 = smov 0  }
   0xc LB: > { %s990_s13 = sadd.s32 4294967295, %s1280_s12   ;;  %s991_s14 = sadd.s32 4294967294, %s1280_s12   ;;  %s1280_s12 = sphi %s1349_s12, %s24_s12   ;;  %s1276_s11 = sphi %s1347_s11, %s1565_s11   ;;  %s1272_s2 = sphi %s1345_s2, %s1564_s2   ;;  %s1268_s10 = sphi %s1343_s10, %s1563_s10   ;;  %s1264_s9 = sphi %s1341_s9, %s1562_s9   ;;  %s1260_s8 = sphi %s1339_s8, %s1561_s8   ;;  %s1256_s30 = sphi %s1337_s30, %s1560_s30   ;;  %s1252_s29 = sphi %s1335_s29, %s1559_s29   ;;  %s1248_s28 = sphi %s1333_s28, %s1558_s28   ;;  %s1244_s27 = sphi %s1331_s27, %s1557_s27   ;;  %s1240_s26 = sphi %s1329_s26, %s1556_s26  }
   0xd   : > { %s33_s15 = sadd.s32 1, %s1272_s2  ;;  %s36_s16 = sadd.s32 1, %s1276_s11 }
   0xe   : > { %p34_p0 = scmp.ge.s32.totalorder %s33_s15, 2  ;;  %s45_s17 = sadd.s32 1, %s1260_s8 }
   0xf   : > { %p52_p1 = scmp.ne.s32.totalorder %s1260_s8, %s1256_s30  ;;  %p53_p2 = scmp.eq.s32.totalorder %s1280_s12, 0 }
  0x10   : > { %s1567_s15 = smov (%p34_p0, %s33_s15), 0  ;;  %s1569_s16 = smov (!%p34_p0, %s36_s16), %s1276_s11 }
  0x11   : > { %1541 = sst [smem:[#allocation12_spill]] %s1567_s15  ;;  %s41_s18 = ssub.s32 %s1272_s2, %s1567_s15 }
  0x12   : > { %p1395_p3 = por %p53_p2, %p52_p1  ;;  %p38_p4 = scmp.ge.s32.totalorder %s1569_s16, 2 }
  0x13   : > { %p58_p5 = scmp.ne.s32.totalorder %s1256_s30, %s1252_s29  ;;  %p59_p6 = scmp.eq.s32.totalorder %s990_s13, 0 }
  0x14   : > { %s197_s20 = sadd.s32 1, %s1248_s28  ;;  %s1571_s16 = smov (%p38_p4, %s1569_s16), 0 }
  0x15   : > { %1543 = sst [smem:[#allocation13_spill]] %s1571_s16  ;;  %p1403_p7 = por %p59_p6, %p58_p5 }
  0x16   : > { %p207_p8 = scmp.ne.s32.totalorder %s1248_s28, %s1244_s27  ;;  %s40_s22 = ssub.s32 %s1276_s11, %s1571_s16 }
  0x17   : > { %p208_p9 = scmp.eq.s32.totalorder %s990_s13, 3  ;;  %s42_s23 = sor.u32 %s41_s18, %s40_s22 }
  0x18   : > { %p195_p10 = scmp.eq.s32.totalorder %s40_s22, 0  ;;  %p43_p11 = scmp.eq.s32.totalorder %s42_s23, 0 }
  0x19   : > { %p1411_p12 = por %p208_p9, %p207_p8  ;;  %p213_p13 = scmp.ne.s32.totalorder %s1244_s27, %s1240_s26 }
  0x1a   : > { %s1416_s25 = scalar_select %p195_p10, %s1248_s28, %s197_s20  }
  0x1b   : > { %s1545_s24 = scalar_select %p1411_p12, 1, 0 }
  0x1c   : > { %1547 = sst [smem:[#allocation15_spill]] %s1416_s25  ;;  %p214_p0 = scmp.eq.s32.totalorder %s991_s14, 3 }
  0x1d   : > { %1546 = sst [smem:[#allocation14_spill]] %s1545_s24  ;;  %p1017_p1 = scmp.lt.s32.totalorder %s1280_s12, 4 }
  0x1e   : > { %s1419_s29 = scalar_select %p43_p11, %s1260_s8, %s45_s17  }
  0x1f   : > { %p1424_p2 = por %p214_p0, %p213_p13  ;;  %s252_s13 = sand.u32 1, %s1260_s8  }
  0x20   : > { %1548 = sst [smem:[#allocation16_spill]] %s1419_s29  ;;  %s994_s18 = sshll.u32 %s252_s13, 2 }
  0x21   : > { %s995_s22 = sshll.u32 %s1276_s11, 1  ;;  %s256_s16 = scalar_lea.vmem [#allocation6], %s994_s18 }
  0x22   : > { %s260_s23 = sadd.s32 %s1272_s2, %s995_s22  ;;  %s266_s24 = sshll.u32 %s256_s16, 4  ;;  %s267_s24 = int_to_ptr.vmem [resolvable:$true] %s266_s24 }
  0x23   : > { %s996_s7 = sshll.u32 %s260_s23, 2  ;;  %p1010_p4 = pnand %p1017_p1, %p1395_p3 }
  0x24   : > { %s262_s29 = scalar_lea.hbm %s1527_s0, %s996_s7  ;;  %p997_p5 = scmp.ge.s32.totalorder %s1280_s12, 1 }
  0x25   : > { %s264_s14 = sshll.u32 %s262_s29, 4  ;;  %s253_s25 = scalar_lea.sflag [#allocation7], %s252_s13  ;;  %s265_s14 = int_to_ptr.hbm [resolvable:$true] %s264_s14 }
  0x26   : > { %1012 = dma.hbm_to_vmem [thread:$0]  (!%p1010_p4), %s265_s14, 64, %s267_s24, %s253_s25  }
  0x27   : > { %p271_p6 = scmp.lt.s32.totalorder %s1280_s12, 5 }
  0x29   : > { %p272_p8 = pnand %p997_p5, %p271_p6 }
  0x2a   : > { %s277_s18 = sand.u32 (!%p272_p8), 1, %s1256_s30  }
  0x2b   : > { %275 = sbr.rel (%p272_p8) target bundleno = 1111 (0x457), region = 48  ;;  %s998_s16 = sshll.u32 (!%p272_p8), %s277_s18, 2 }
  0x2c   : > { %s278_s22 = scalar_lea.sflag (!%p272_p8), [#allocation7], %s277_s18  ;;  %s281_s23 = scalar_lea.vmem (!%p272_p8), [#allocation6], %s998_s16 }
  0x30   : > { %1231 = dma.done.wait (%p1403_p7), %s278_s22, 64  }
  0x31   : > { %1233 = vsyncadd (%p1403_p7), %s278_s22, 4294967232  ;;  %s310_s7 = sand.u32 1, %s1244_s27   ;;  %p999_p3 = scmp.ne.s32.totalorder %s1264_s9, 0 }
  0x32   : > { %s1446_s19 = scalar_lea.vmem [#allocation9], %s310_s7 }
  0x33   : > { %315 = sbr.rel (%p999_p3) target bundleno = 60 (0x3c), region = 56 }
  0x38   : > { %vm316_vm0 = vcmask 0   ;;  %vm319_vm1 = vcmask 24576   ;;  %v1282_v0 = vmov -inf   ;;  %v1283_v1 = vmov 0.0  }
  0x39   : > { %317 = vst.msk [vmem:[#allocation2] sm:$0x1] %vm316_vm0, %v1282_v0 }
  0x3a   : > { %318 = vst.msk [vmem:[#allocation3] sm:$0x1] %vm316_vm0, %v1283_v1 }
  0x3b   : > { %320 = vst.msk [vmem:[#allocation4] sm:$0x1] %vm319_vm1, %v1283_v1 }
  0x3c PF: > { %v322_v2 = vld [vmem:[%s1528_s1] sm:$0xf]  ;;  %v1284_v3 = vmov 0   ;;  %vm329_vm2 = vcmask 1043456   ;;  %s337_s25 = sld [smem:[#allocation5]]  ;;  %vm361_vm3 = vcmask 0  }
  0x3d   : > { %1111 = vset.pattern.permute.xlu0 %v1284_v3  ;;  %1112 = vset.pattern.permute.xlu1 %v1284_v3  ;;  %v321_v4 = vld [vmem:[%s281_s23] sm:$0xf]  ;;  %vm518_vm4 = vcmask 24576   ;;  %p1000_p7 = scmp.ne.s32.totalorder %s1264_s9, 1 }
  0x3e   : > { %325 = vperm.xlu0 %1111, %v322_v2   ;;  %v378_v5 = vand.u32 4294901760, %v321_v4 }
  0x40   : > { %455 = vmatpush.xpose.msra.mxu3 %v378_v5  ;;  %379 = vmatpush.xpose.msra.mxu0 %v378_v5  ;;  %v340_v17 = vld [vmem:[#allocation2] sm:$0x1]  ;;  %v405_v23 = vsub.f32 %v321_v4, %v378_v5 }
  0x41   : > { %v356_v37 = vld [vmem:[#allocation3] sm:$0x1] }
  0x42   : > { %v338_v14 = vstv %s337_s25  ;;  %v406_v24 = vand.u32 4294901760, %v405_v23  ;;  %432 = vmatpush.xpose.msra.mxu2 %v405_v23  ;;  %v509_v50 = vld [vmem:[#allocation4] sm:$0x1] }
  0x44   : > { %v407_v25 = vsub.f32 %v405_v23, %v406_v24  ;;  %481 = vmatpush.xpose.msrb.mxu0 %v406_v24 }
  0x46   : > { %v408_v26 = vand.u32 4294901760, %v407_v25 }
  0x48   : > { %409 = vmatpush.xpose.msra.mxu1 %v408_v26 }
  0x4c   : > { %503 = vmatpush.xpose.msrb.mxu1 %v378_v5 }
  0xb0   : > { %v326_v6 = vpop.permute.xlu0 %325 }
  0xb1   : > { %v328_v7 = vmul.f32 %v326_v6, %v321_v4 }
  0xb3   : > { %v330_v8 = vsel %vm329_vm2, %v328_v7, 0.0 }
  0xb4   : > { %v331_v9 = vrot.slane %v330_v8, 4 }
  0xb6   : > { %v332_v10 = vadd.f32 %v331_v9, %v330_v8 }
  0xb8   : > { %v333_v11 = vrot.slane %v332_v10, 2 }
  0xba   : > { %v334_v12 = vadd.f32 %v333_v11, %v332_v10 }
  0xbc   : > { %v335_v13 = vrot.slane %v334_v12, 1 }
  0xbe   : > { %v336_v15 = vadd.f32 %v335_v13, %v334_v12 }
  0xc0   : > { %v339_v16 = vadd.f32 %v338_v14, %v336_v15 }
  0xc2   : > { %341 = vmax.xlane.f32.xlu0 %v339_v16 }
 0x135   : > { %v342_v18 = vpop.xlane.xlu0 %341 }
 0x136   : > { %v343_v19 = vmax.f32 %v340_v17, %v342_v18 }
 0x138   : > { %v344_v20 = vsub.f32 %v340_v17, %v343_v19  ;;  %520 = vst.msk [vmem:[#allocation2] sm:$0x1] %vm361_vm3, %v343_v19  ;;  %349 = vperm.xlu1 %1112, %v343_v19  }
 0x13a   : > { %v345_v21 = vmul.f32 1.442695, %v344_v20 }
 0x13c   : > { %1113 = vpow2.f32 %v345_v21 }
 0x142   : > { %v1114_v22 = vpop.eup %1113 }
 0x143   : > { %512 = vperm.xlu1 %1112, %v1114_v22   ;;  %v357_v38 = vmul.f32 %v1114_v22, %v356_v37 }
 0x1aa   : > { %v350_v27 = vpop.permute.xlu1 %349 }
 0x1ab   : > { %v352_v28 = vperm.slane %v350_v27, 0 }
 0x1ad   : > { %v353_v29 = vsub.f32 %v339_v16, %v352_v28 }
 0x1af   : > { %v354_v30 = vmul.f32 1.442695, %v353_v29 }
 0x1b1   : > { %1115 = vpow2.f32 %v354_v30 }
 0x1b5   : > { %v513_v46 = vpop.permute.xlu1 %512 }
 0x1b6   : > { %v515_v48 = vperm.slane %v513_v46, 0 }
 0x1b7   : > { %v1116_v31 = vpop.eup %1115 }
 0x1b8   : > { %358 = vadd.xlane.f32.xlu2 %v1116_v31  ;;  %v380_v32 = vand.u32 4294901760, %v1116_v31  ;;  %v516_v54 = vmul.f32 %v515_v48, %v509_v50 }
 0x1ba   : > { %411 = vmatmul.f32.vlgmr.msra.gmra.mxu1 %v380_v32  ;;  %v381_v33 = vsub.f32 %v1116_v31, %v380_v32 }
 0x1bc   : > { %435 = vmatmul.f32.vlgmr.msra.gmra.mxu2 %v381_v33  ;;  %v382_v34 = vand.u32 4294901760, %v381_v33 }
 0x1be   : > { %459 = vmatmul.f32.vlgmr.msra.gmra.mxu3 %v382_v34  ;;  %v383_v35 = vsub.f32 %v381_v33, %v382_v34 }
 0x1c0   : > { %v384_v36 = vand.u32 4294901760, %v383_v35 }
 0x1c2   : > { %385 = vmatmul.f32.vlgmr.msra.gmra.mxu0 %v384_v36  ;;  %505 = vmatmul.f32.vlgmr.msrb.gmra.mxu1 %v380_v32 }
 0x1ca   : > { %483 = vmatmul.f32.vlgmr.msrb.gmra.mxu0 %v380_v32 }
 0x22b   : > { %v359_v39 = vpop.xlane.xlu2 %358 }
 0x22c   : > { %v360_v40 = vadd.f32 %v359_v39, %v357_v38 }
 0x22e   : > { %362 = vst.msk [vmem:[#allocation3] sm:$0x1] %vm361_vm3, %v360_v40 }
 0x237   : > { %v412_v41 = vpop.f32.mrf.mxu1 }
 0x23f   : > { %v386_v42 = vpop.f32.mrf.mxu0  ;;  %v436_v44 = vpop.f32.mrf.mxu2 }
 0x240   : > { %v413_v43 = vadd.f32 %v412_v41, %v386_v42  ;;  %v506_v53 = vpop.f32.mrf.mxu1 }
 0x241   : > { %v460_v47 = vpop.f32.mrf.mxu3 }
 0x242   : > { %v437_v45 = vadd.f32 %v436_v44, %v413_v43 }
 0x244   : > { %v461_v49 = vadd.f32 %v460_v47, %v437_v45 }
 0x247   : > { %v484_v51 = vpop.f32.mrf.mxu0 }
 0x248   : > { %v485_v52 = vadd.f32 %v484_v51, %v461_v49 }
 0x24a   : > { %v507_v55 = vadd.f32 %v506_v53, %v485_v52  ;;  %524 = sbr.rel (%p1000_p7) target bundleno = 1091 (0x443), region = 60 }
 0x24c   : > { %v517_v56 = vadd.f32 %v516_v54, %v507_v55 }
 0x24e   : > { %519 = vst.msk [vmem:[#allocation4] sm:$0x1] %vm518_vm4, %v517_v56 }
 0x24f   : > { %v526_v57 = vld [vmem:[#allocation3] sm:$0x1]  ;;  %v1285_v58 = vmov 0   ;;  %vm550_vm9 = vcmask 31744   ;;  %v549_v22 = vld [vmem:[%s1531_s4] sm:$0x1] }
 0x250   : > { %1117 = vset.pattern.permute.xlu0 %v1285_v58  ;;  %1118 = vrcp.f32 %v526_v57  ;;  %v538_v61 = vand.u32 2147483648, %v526_v57  ;;  %vm532_vm5 = vweird.f32 %v526_v57  ;;  %v536_v63 = vand.u32 2147483647, %v526_v57  ;;  %v548_v5 = vld [vmem:[%s1530_s3] sm:$0xf] }
 0x251   : > { %v555_v6 = vsel %vm329_vm2, %v548_v5, 0  ;;  %v723_v26 = vld [vmem:[%s1532_s5] sm:$0xf]  ;;  %vm896_vm1 = vcmask 57344  }
 0x252   : > { %v539_v1 = vor.u32 1.1754944e-38, %v538_v61  ;;  %vm537_vm8 = vcmp.eq.f32.partialorder %v536_v63, 8.507059e+37  ;;  %v572_v7 = vand.u32 4294901760, %v555_v6  ;;  %v729_v28 = vsel %vm329_vm2, %v723_v26, 0 }
 0x253   : > { %v746_v30 = vand.u32 4294901760, %v729_v28 }
 0x254   : > { %v599_v8 = vsub.f32 %v555_v6, %v572_v7  ;;  %649 = vmatpush.msra.mxu3 %v572_v7  ;;  %573 = vmatpush.msra.mxu0 %v572_v7 }
 0x255   : > { %v525_v13 = vld [vmem:[#allocation4] sm:$0x1]  ;;  %v773_v33 = vsub.f32 %v729_v28, %v746_v30 }
 0x256   : > { %v1119_v59 = vpop.eup %1118  ;;  %v600_v9 = vand.u32 4294901760, %v599_v8  ;;  %626 = vmatpush.msra.mxu2 %v599_v8 }
 0x257   : > { %v528_v60 = vmul.f32 %v1119_v59, %v526_v57  ;;  %vm533_vm6 = vweird.f32 %v1119_v59  ;;  %v774_v36 = vand.u32 4294901760, %v773_v33 }
 0x258   : > { %vm534_vm7 = vmor %vm532_vm5, %vm533_vm6  ;;  %v601_v10 = vsub.f32 %v599_v8, %v600_v9  ;;  %675 = vmatpush.msrb.mxu0 %v600_v9  ;;  %747 = vmatpush.msrb.mxu2 %v746_v30 }
 0x259   : > { %v529_v62 = vsub.f32 1.0, %v528_v60  ;;  %v775_v39 = vsub.f32 %v773_v33, %v774_v36 }
 0x25a   : > { %v602_v11 = vand.u32 4294901760, %v601_v10 }
 0x25b   : > { %v530_v0 = vmul.f32 %v1119_v59, %v529_v62  ;;  %v776_v41 = vand.u32 4294901760, %v775_v39  ;;  %v724_v62 = vld [vmem:[%s1533_s6] sm:$0x1] }
 0x25c   : > { %603 = vmatpush.msra.mxu1 %v602_v11 }
 0x25d   : > { %v531_v2 = vadd.f32 %v1119_v59, %v530_v0  ;;  %777 = vmatpush.msrb.mxu3 %v776_v41 }
 0x25e   : > { %697 = vmatpush.msrb.mxu1 %v572_v7 }
 0x25f   : > { %v535_v3 = vsel %vm534_vm7, %v1119_v59, %v531_v2 }
 0x260   : > { %v540_v4 = vsel %vm537_vm8, %v539_v1, %v535_v3 }
 0x261   : > { %543 = vperm.xlu0 %1117, %v540_v4  }
 0x2d3   : > { %v544_v12 = vpop.permute.xlu0 %543 }
 0x2d4   : > { %v546_v14 = vperm.slane %v544_v12, 0 }
 0x2d6   : > { %v547_v15 = vmul.f32 %v546_v14, %v525_v13 }
 0x2d8   : > { %v552_v16 = vsel %vm550_vm9, %v547_v15, 0 }
 0x2d9   : > { %v574_v17 = vand.u32 4294901760, %v552_v16 }
 0x2db   : > { %605 = vmatmul.f32.vlgmr.msra.gmra.mxu1 %v574_v17  ;;  %v575_v18 = vsub.f32 %v552_v16, %v574_v17 }
 0x2dc   : > { %823 = vmatpush.msra.mxu1 %v746_v30 }
 0x2dd   : > { %629 = vmatmul.f32.vlgmr.msra.gmra.mxu2 %v575_v18  ;;  %v576_v19 = vand.u32 4294901760, %v575_v18 }
 0x2de   : > { %849 = vmatpush.msra.mxu2 %v774_v36 }
 0x2df   : > { %653 = vmatmul.f32.vlgmr.msra.gmra.mxu3 %v576_v19  ;;  %v577_v20 = vsub.f32 %v575_v18, %v576_v19 }
 0x2e0   : > { %871 = vmatpush.msra.mxu3 %v746_v30 }
 0x2e1   : > { %v578_v21 = vand.u32 4294901760, %v577_v20 }
 0x2e3   : > { %579 = vmatmul.f32.vlgmr.msra.gmra.mxu0 %v578_v21  ;;  %699 = vmatmul.f32.vlgmr.msrb.gmra.mxu1 %v574_v17 }
 0x2e4   : > { %800 = vmatpush.msra.mxu0 %v773_v33 }
 0x2eb   : > { %677 = vmatmul.f32.vlgmr.msrb.gmra.mxu0 %v574_v17 }
 0x358   : > { %v606_v23 = vpop.f32.mrf.mxu1 }
 0x360   : > { %v580_v24 = vpop.f32.mrf.mxu0  ;;  %v630_v29 = vpop.f32.mrf.mxu2 }
 0x361   : > { %v581_v25 = vadd.f32 %v580_v24, %v549_v22  ;;  %v700_v38 = vpop.f32.mrf.mxu1 }
 0x362   : > { %v654_v32 = vpop.f32.mrf.mxu3 }
 0x363   : > { %v607_v27 = vadd.f32 %v606_v23, %v581_v25 }
 0x365   : > { %v631_v31 = vadd.f32 %v630_v29, %v607_v27 }
 0x367   : > { %v655_v34 = vadd.f32 %v654_v32, %v631_v31 }
 0x368   : > { %v678_v35 = vpop.f32.mrf.mxu0 }
 0x369   : > { %v679_v37 = vadd.f32 %v678_v35, %v655_v34 }
 0x36b   : > { %v701_v40 = vadd.f32 %v700_v38, %v679_v37 }
 0x36d   : > { %v1001_v42 = vmul.f32 -1.442695, %v701_v40 }
 0x36f   : > { %1120 = vpow2.f32 %v1001_v42 }
 0x375   : > { %v1121_v43 = vpop.eup %1120 }
 0x376   : > { %v706_v44 = vadd.f32 1.0, %v1121_v43 }
 0x378   : > { %1122 = vrcp.f32 %v706_v44  ;;  %v718_v48 = vand.u32 2147483648, %v706_v44  ;;  %v716_v50 = vand.u32 2147483647, %v706_v44  ;;  %vm712_vm11 = vweird.f32 %v706_v44 }
 0x37a   : > { %v719_v52 = vor.u32 1.1754944e-38, %v718_v48  ;;  %vm717_vm13 = vcmp.eq.f32.partialorder %v716_v50, 8.507059e+37 }
 0x37e   : > { %v1123_v45 = vpop.eup %1122 }
 0x37f   : > { %v708_v46 = vmul.f32 %v1123_v45, %v706_v44  ;;  %vm713_vm10 = vweird.f32 %v1123_v45 }
 0x380   : > { %vm714_vm12 = vmor %vm712_vm11, %vm713_vm10 }
 0x381   : > { %v709_v47 = vsub.f32 1.0, %v708_v46 }
 0x383   : > { %v710_v49 = vmul.f32 %v1123_v45, %v709_v47 }
 0x385   : > { %v711_v51 = vadd.f32 %v1123_v45, %v710_v49 }
 0x387   : > { %v715_v53 = vsel %vm714_vm12, %v1123_v45, %v711_v51 }
 0x388   : > { %v720_v54 = vsel %vm717_vm13, %v719_v52, %v715_v53 }
 0x389   : > { %v722_v55 = vmul.f32 %v720_v54, %v701_v40 }
 0x38b   : > { %v726_v56 = vsel %vm550_vm9, %v722_v55, 0 }
 0x38c   : > { %v748_v57 = vand.u32 4294901760, %v726_v56 }
 0x38e   : > { %779 = vmatmul.f32.vlgmr.msrb.gmra.mxu3 %v748_v57  ;;  %v749_v58 = vsub.f32 %v726_v56, %v748_v57 }
 0x390   : > { %803 = vmatmul.f32.vlgmr.msra.gmra.mxu0 %v749_v58  ;;  %v750_v59 = vand.u32 4294901760, %v749_v58 }
 0x392   : > { %827 = vmatmul.f32.vlgmr.msra.gmra.mxu1 %v750_v59  ;;  %v751_v60 = vsub.f32 %v749_v58, %v750_v59 }
 0x394   : > { %v752_v61 = vand.u32 4294901760, %v751_v60 }
 0x396   : > { %753 = vmatmul.f32.vlgmr.msrb.gmra.mxu2 %v752_v61  ;;  %873 = vmatmul.f32.vlgmr.msra.gmra.mxu3 %v748_v57 }
 0x39e   : > { %851 = vmatmul.f32.vlgmr.msra.gmra.mxu2 %v748_v57 }
 0x40d   : > { %v804_v3 = vpop.f32.mrf.mxu0 }
 0x40f   : > { %v828_v5 = vpop.f32.mrf.mxu1 }
 0x411   : > { %v780_v63 = vpop.f32.mrf.mxu3 }
 0x419   : > { %v754_v0 = vpop.f32.mrf.mxu2  ;;  %v874_v9 = vpop.f32.mrf.mxu3 }
 0x41a   : > { %v755_v1 = vadd.f32 %v754_v0, %v724_v62 }
 0x41c   : > { %v781_v2 = vadd.f32 %v780_v63, %v755_v1 }
 0x41e   : > { %v805_v4 = vadd.f32 %v804_v3, %v781_v2 }
 0x420   : > { %v829_v6 = vadd.f32 %v828_v5, %v805_v4 }
 0x421   : > { %v852_v7 = vpop.f32.mrf.mxu2 }
 0x422   : > { %v853_v8 = vadd.f32 %v852_v7, %v829_v6 }
 0x424   : > { %v875_v10 = vadd.f32 %v874_v9, %v853_v8 }
 0x426   : > { %v1002_v11 = vmul.f32 -1.442695, %v875_v10 }
 0x428   : > { %1124 = vpow2.f32 %v1002_v11 }
 0x42e   : > { %v1125_v12 = vpop.eup %1124 }
 0x42f   : > { %v880_v13 = vadd.f32 1.0, %v1125_v12 }
 0x431   : > { %1126 = vrcp.f32 %v880_v13  ;;  %v892_v17 = vand.u32 2147483648, %v880_v13  ;;  %v890_v19 = vand.u32 2147483647, %v880_v13  ;;  %vm886_vm15 = vweird.f32 %v880_v13 }
 0x433   : > { %v893_v21 = vor.u32 1.1754944e-38, %v892_v17  ;;  %vm891_vm2 = vcmp.eq.f32.partialorder %v890_v19, 8.507059e+37 }
 0x437   : > { %v1127_v14 = vpop.eup %1126 }
 0x438   : > { %v882_v15 = vmul.f32 %v1127_v14, %v880_v13  ;;  %vm887_vm14 = vweird.f32 %v1127_v14 }
 0x439   : > { %vm888_vm0 = vmor %vm886_vm15, %vm887_vm14 }
 0x43a   : > { %v883_v16 = vsub.f32 1.0, %v882_v15 }
 0x43c   : > { %v884_v18 = vmul.f32 %v1127_v14, %v883_v16 }
 0x43e   : > { %v885_v20 = vadd.f32 %v1127_v14, %v884_v18 }
 0x440   : > { %v889_v22 = vsel %vm888_vm0, %v1127_v14, %v885_v20 }
 0x441   : > { %v894_v23 = vsel %vm891_vm2, %v893_v21, %v889_v22 }
 0x442   : > { %897 = vst.msk [vmem:[%s1446_s19] sm:$0x1] %vm896_vm1, %v894_v23 }
 0x443 PF: > { %s1550_s24 = sld [smem:[#allocation17_spill]]  ;;  %s909_s9 = sshll.u32 %s1446_s19, 4  ;;  %s910_s9 = int_to_ptr.vmem [resolvable:$true] %s909_s9 }
 0x444   : > { %s899_s13 = scalar_lea.sflag [#allocation8], %s310_s7 }
 0x449   : > { %s907_s25 = scalar_lea.hbm %s1550_s24, %s1268_s10  ;;  %s1178_s16 = scalar_lea.hbm %s1550_s24, 2 }
 0x44a   : > { %s911_s29 = sshll.u32 %s907_s25, 4  ;;  %s912_s29 = int_to_ptr.hbm [resolvable:$true] %s911_s29 }
 0x44b   : > { %s1172_s20 = sshra.s32 %s912_s29, 4  ;;  %s1173_s20 = int_to_ptr.hbm [resolvable:$true] %s1172_s20 }
 0x44c   : > { %s1174_s17 = scalar_lea.hbm %s1173_s20, 1  ;;  %p1179_p13 = scmp.lt.s32.totalorder %s1173_s20, %s1550_s24 }
 0x44d   : > { %p1175_p9 = scmp.ne.s32.totalorder %s1173_s20, %s1174_s17  ;;  %p1180_p0 = scmp.lt.s32.totalorder %s1178_s16, %s1174_s17 }
 0x44f   : > { %p1176_p10 = pnand %p1175_p9, %p1411_p12  ;;  %p1181_p1 = por %p1180_p0, %p1179_p13 }
 0x451   : > { %p1177_p11 = pneg %p1176_p10 }
 0x453   : > { %p1182_p4 = pnand %p1181_p1, %p1177_p11 }
 0x455   : > { %1185 = shalt.err (!%p1182_p4)
}
 0x456   : > { %1007 = dma.vmem_to_hbm [thread:$0]  (%p1411_p12), %s910_s9, 16, %s912_s29, %s899_s13  }
 0x457 PF: > { %p1018_p5 = scmp.ge.s32.totalorder %s1280_s12, 2  ;;  %s923_s10 = sand.u32 1, %s1240_s26  }
 0x458   : > { %s924_s7 = scalar_lea.sflag [#allocation8], %s923_s10 }
 0x459   : > { %p1014_p6 = pnand %p1018_p5, %p1424_p2 }
 0x45b   : > { %p1015_p8 = pneg %p1014_p6 }
 0x45d   : > { %1235 = dma.done.wait (%p1015_p8), %s924_s7, 16  }
 0x45e   : > { %1237 = vsyncadd (%p1015_p8), %s924_s7, 4294967280  ;;  %s24_s12 = sadd.s32 1, %s1280_s12   ;;  %s1552_s19 = sld [smem:[#allocation15_spill]] }
 0x45f   : > { %p21_p3 = scmp.ge.s32.totalorder %s24_s12, 6   ;;  %s1553_s21 = sld [smem:[#allocation16_spill]] }
 0x460   : > { %s1554_s25 = sld [smem:[#allocation12_spill]]  ;;  %s1556_s26 = smov %s1244_s27 }
 0x461   : > { %s1555_s13 = sld [smem:[#allocation13_spill]]  ;;  %s1557_s27 = smov %s1248_s28 }
 0x462   : > { %s1559_s29 = smov %s1256_s30  ;;  %s1560_s30 = smov %s1260_s8 }
 0x463   : > { %s1562_s9 = smov %s1272_s2  ;;  %s1563_s10 = smov %s1276_s11 }
 0x464   : > { %s1558_s28 = smov %s1552_s19  ;;  %23 = sbr.rel (!%p21_p3) target bundleno = 12 (0xc), region = 101 }
 0x465   : > { %s1561_s8 = smov %s1553_s21 }
 0x466   : > { %s1564_s2 = smov %s1554_s25 }
 0x467   : > { %s1565_s11 = smov %s1555_s13 }
 0x469   :  { %929 = vsyncpa [#allocation7], 1 }
 0x46a   :  { %931 = vsyncpa [#allocation7 + $0x1], 1 }
 0x46b   :  { %932 = vsyncpa [#allocation8], 1 }
 0x46c   :  { %934 = vsyncpa [#allocation8 + $0x1], 1 }

</bundles_post_ra>
